<compile_context>
chip_gen: v6e
topology: v6e:2x2x1
jax: 0.10.0
libtpu: 0.0.40
codegen_flags: <defaults>
</compile_context>

<pallas_src>
import functools
import math

import jax
import jax.numpy as jnp
from jax import lax
from jax.experimental import pallas as pl
from jax.experimental.pallas import tpu as pltpu


# ----------------------------------------------------------------------------
# helpers
# ----------------------------------------------------------------------------
def _round_up(x, m):
    return ((x + m - 1) // m) * m


@functools.lru_cache(maxsize=None)
def _vmem_limit_bytes():
    """Per-generation scoped-VMEM limit (v5e/v6e: 128 MiB phys, v7x: 64 MiB)."""
    cap = 64 * 1024 * 1024                      # conservative fallback (v7x-sized)
    try:
        info = pltpu.get_tpu_info()
        cap = int(getattr(info, "vmem_capacity_bytes", cap) or cap)
    except Exception:
        pass
    # leave headroom for Mosaic-internal scratch; never ask for more than 100 MiB
    return min(int(cap * 3 // 4), 100 * 1024 * 1024)


def _pick_dim(dim, target):
    """Return (tile, padded_dim): full dim when it fits, else target tiles + pad."""
    if dim <= target:
        return dim, dim                          # full-dim block is always legal
    return target, _round_up(dim, target)        # target is a multiple of 8/128


# ----------------------------------------------------------------------------
# Kernel 1: tiled dense layer  y = x @ W_t + b   (W_t is (Din, Dout))
# ----------------------------------------------------------------------------
def linear_kernel(x_ref, w_ref, b_ref, o_ref, acc_ref):
    @pl.when(pl.program_id(2) == 0)
    def _():
        acc_ref[...] = jnp.zeros_like(acc_ref)

    acc_ref[...] += jnp.dot(x_ref[...], w_ref[...],
                            preferred_element_type=jnp.float32)

    @pl.when(pl.program_id(2) == pl.num_programs(2) - 1)
    def _():
        o_ref[...] = (acc_ref[...] + b_ref[...].astype(jnp.float32)
                      ).astype(o_ref.dtype)


def pallas_linear(x2d, w_t, b2d, *, tm_target=512, tn_target=256, tk_target=512):
    """x2d: (M, Din), w_t: (Din, Dout) pre-transposed, b2d: (1, Dout)."""
    m, k = x2d.shape
    k2, n = w_t.shape
    assert k == k2 and b2d.shape == (1, n)

    tm, m_pad = _pick_dim(m, tm_target)          # tm_target multiple of 8
    tn, n_pad = _pick_dim(n, tn_target)          # tn_target multiple of 128
    tk, k_pad = _pick_dim(k, tk_target)          # tk_target multiple of 128

    # zero-pad only when the dim does not fit exactly (no-op for aligned sizes)
    if (m_pad, k_pad) != (m, k):
        x2d = jnp.pad(x2d, ((0, m_pad - m), (0, k_pad - k)))
    if (k_pad, n_pad) != (k, n):
        w_t = jnp.pad(w_t, ((0, k_pad - k), (0, n_pad - n)))
        b2d = jnp.pad(b2d, ((0, 0), (0, n_pad - n)))

    grid = (m_pad // tm, n_pad // tn, k_pad // tk)
    out = pl.pallas_call(
        linear_kernel,
        out_shape=jax.ShapeDtypeStruct((m_pad, n_pad), x2d.dtype),
        grid_spec=pltpu.PrefetchScalarGridSpec(
            num_scalar_prefetch=0,
            grid=grid,
            in_specs=[
                pl.BlockSpec((tm, tk), lambda i, j, kk: (i, kk)),
                pl.BlockSpec((tk, tn), lambda i, j, kk: (kk, j)),
                pl.BlockSpec((1, tn), lambda i, j, kk: (0, j)),
            ],
            out_specs=pl.BlockSpec((tm, tn), lambda i, j, kk: (i, j)),
            scratch_shapes=[pltpu.VMEM((tm, tn), jnp.float32)],
        ),
        compiler_params=pltpu.CompilerParams(
            dimension_semantics=("parallel", "parallel", "arbitrary"),
            vmem_limit_bytes=_vmem_limit_bytes(),
        ),
    )(x2d, w_t, b2d)
    if (m_pad, n_pad) != (m, n):
        out = out[:m, :n]
    return out


# ----------------------------------------------------------------------------
# Kernel 2: flash-style multi-head attention, heads packed along lanes
# ----------------------------------------------------------------------------
def attn_kernel(q_ref, kv_ref, o_ref, m_sc, l_sc, acc_sc, *,
                n_heads, d_model, d_k, kv_len, tk, mask_kv):
    ki = pl.program_id(2)

    @pl.when(ki == 0)
    def _():
        m_sc[...] = jnp.full_like(m_sc, -jnp.inf)
        l_sc[...] = jnp.zeros_like(l_sc)
        acc_sc[...] = jnp.zeros_like(acc_sc)

    q = q_ref[...]        # (tq, d_model)   heads along lanes, 1/sqrt(d_k) pre-folded
    kv = kv_ref[...]      # (tk, 2*d_model) [K | V] fused projection

    if mask_kv:
        # mask out zero-padded KV rows of the partial tile (kv_len is static)
        col = ki * tk + lax.broadcasted_iota(jnp.int32, (1, tk), 1)
        valid = col < kv_len

    for h in range(n_heads):
        lo, hi = h * d_k, (h + 1) * d_k
        qh = q[:, lo:hi]                              # (tq, d_k)
        kh = kv[:, lo:hi]                             # (tk, d_k)
        vh = kv[:, d_model + lo:d_model + hi]         # (tk, d_k)

        # scores: contract on d_k directly — K stays in its stored layout
        s = lax.dot_general(qh, kh, (((1,), (1,)), ((), ())),
                            preferred_element_type=jnp.float32)    # (tq, tk)
        if mask_kv:
            s = jnp.where(valid, s, -1e30)

        m_prev = m_sc[h]                                            # (tq, 1)
        m_new = jnp.maximum(m_prev, jnp.max(s, axis=-1, keepdims=True))
        corr = jnp.exp(m_prev - m_new)
        p = jnp.exp(s - m_new)                                      # (tq, tk)
        l_sc[h] = corr * l_sc[h] + jnp.sum(p, axis=-1, keepdims=True)
        acc_sc[h] = corr * acc_sc[h] + jnp.dot(
            p.astype(vh.dtype), vh, preferred_element_type=jnp.float32)
        m_sc[h] = m_new

    @pl.when(ki == pl.num_programs(2) - 1)
    def _():
        l = l_sc[...]                                 # (n_heads, tq, 1)
        inv = pl.reciprocal(l, approx=True)           # EUP slot
        inv = inv * (2.0 - l * inv)                   # one Newton step, finalize-only
        ctx = acc_sc[...] * inv                       # (n_heads, tq, d_k)
        for h in range(n_heads):                      # lane merge once per Q tile
            o_ref[:, h * d_k:(h + 1) * d_k] = ctx[h].astype(o_ref.dtype)


def pallas_attention(q_proj, kv_proj, n_heads, *, tq_target=256, tk_target=512):
    """q_proj: (B, Lq, d_model), kv_proj: (B, Lk, 2*d_model) -> (B, Lq, d_model)."""
    B, Lq, d_model = q_proj.shape
    Bk, Lk, two_d = kv_proj.shape
    assert Bk == B and two_d == 2 * d_model
    d_k = d_model // n_heads
    dt = q_proj.dtype
    itemsize = jnp.dtype(dt).itemsize

    # Q tile: full length when it fits, else 256-row tiles (multiple of 8)
    tq, lq_pad = _pick_dim(Lq, tq_target)

    # KV tile: lane-dense (multiple of 128) whenever Lk >= 128, sized so the
    # double-buffered blocks + (lane-padded) scratch fit the VMEM budget.
    if Lk < 128:
        tk, lk_pad = Lk, Lk
    else:
        budget = int(_vmem_limit_bytes() * 0.6)
        fixed = 4 * tq * d_model * itemsize                         # q + out, 2 bufs each
        fixed += n_heads * tq * max(_round_up(d_k, 128), 128) * 4   # acc scratch (padded)
        fixed += 2 * n_heads * tq * 128 * 4                         # m/l stats (padded)
        per_row = 2 * 2 * d_model * itemsize                        # KV block, 2 bufs
        avail = max(budget - fixed, 128 * per_row)
        tk = max(128, (avail // per_row) // 128 * 128)
        tk = int(min(tk, tk_target, _round_up(Lk, 128)))
        lk_pad = _round_up(Lk, tk)

    if lq_pad != Lq:
        q_proj = jnp.pad(q_proj, ((0, 0), (0, lq_pad - Lq), (0, 0)))
    if lk_pad != Lk:
        kv_proj = jnp.pad(kv_proj, ((0, 0), (0, lk_pad - Lk), (0, 0)))

    grid = (B, lq_pad // tq, lk_pad // tk)
    kernel = functools.partial(
        attn_kernel, n_heads=n_heads, d_model=d_model, d_k=d_k,
        kv_len=Lk, tk=tk, mask_kv=(lk_pad != Lk))

    out = pl.pallas_call(
        kernel,
        out_shape=jax.ShapeDtypeStruct((B, lq_pad, d_model), dt),
        grid_spec=pltpu.PrefetchScalarGridSpec(
            num_scalar_prefetch=0,
            grid=grid,
            in_specs=[
                pl.BlockSpec((None, tq, d_model), lambda b, qi, ki: (b, qi, 0)),
                pl.BlockSpec((None, tk, 2 * d_model), lambda b, qi, ki: (b, ki, 0)),
            ],
            out_specs=pl.BlockSpec((None, tq, d_model), lambda b, qi, ki: (b, qi, 0)),
            scratch_shapes=[
                pltpu.VMEM((n_heads, tq, 1), jnp.float32),    # running max
                pltpu.VMEM((n_heads, tq, 1), jnp.float32),    # running denom
                pltpu.VMEM((n_heads, tq, d_k), jnp.float32),  # per-head context acc
            ],
        ),
        compiler_params=pltpu.CompilerParams(
            dimension_semantics=("parallel", "parallel", "arbitrary"),
            vmem_limit_bytes=_vmem_limit_bytes(),
        ),
    )(q_proj, kv_proj)

    if lq_pad != Lq:
        out = out[:, :Lq]
    return out


# ----------------------------------------------------------------------------
# Full module forward
# ----------------------------------------------------------------------------
def prepare_params(p, n_heads, dtype=jnp.float32):
    """One-time prep: transpose weights, fold 1/sqrt(d_k) into the Q projection,
    fuse K/V weights, make biases 2-D, optionally cast to bf16."""
    d_model = p["wq"].shape[0]
    d_k = d_model // n_heads
    scale = 1.0 / math.sqrt(d_k)
    prep = {
        "wq_t": jnp.transpose(p["wq"]) * scale,                        # (Din, Dout)
        "bq": (p["bq"] * scale).reshape(1, -1),
        "wkv_t": jnp.concatenate(
            [jnp.transpose(p["wk"]), jnp.transpose(p["wv"])], axis=1), # (Din, 2*Dout)
        "bkv": jnp.concatenate([p["bk"], p["bv"]]).reshape(1, -1),
        "wo_t": jnp.transpose(p["wo"]),
        "bo": p["bo"].reshape(1, -1),
    }
    return {k: v.astype(dtype) for k, v in prep.items()}


def multi_headed_attention_forward(prep, query, key, n_heads):
    """query: (B, Lq, d_model), key: (B, Lk, d_model) -> (B, Lq, d_model)."""
    dt = prep["wq_t"].dtype
    query = query.astype(dt)
    key = key.astype(dt)
    B, Lq, d_model = query.shape
    Lk = key.shape[1]

    # init_keys(key): fused K+V projection — `key` read from HBM once
    kv_proj = pallas_linear(key.reshape(B * Lk, d_model),
                            prep["wkv_t"], prep["bkv"]).reshape(B, Lk, 2 * d_model)
    # query projection (1/sqrt(d_k) already folded into the weights/bias)
    q_proj = pallas_linear(query.reshape(B * Lq, d_model),
                           prep["wq_t"], prep["bq"]).reshape(B, Lq, d_model)

    # flash attention with in-kernel head split/merge (no HBM transposes)
    ctx = pallas_attention(q_proj, kv_proj, n_heads)          # (B, Lq, d_model)

    # TODO(synk): optionally fuse this projection into the attention finalize.
    out = pallas_linear(ctx.reshape(B * Lq, d_model),
                        prep["wo_t"], prep["bo"]).reshape(B, Lq, d_model)
    return out


# ----------------------------------------------------------------------------
# Pure-JAX reference for verification (PyTorch-layout params)
# ----------------------------------------------------------------------------
def reference_forward(params, query, key, n_heads):
    B, Lq, d_model = query.shape
    d_k = d_model // n_heads

    def lin(x, w, b):
        return x @ w.T + b

    def chunks(x):
        b, l, _ = x.shape
        return jnp.transpose(x.reshape(b, l, n_heads, d_k), (0, 2, 1, 3))

    q_h = chunks(lin(query, params["wq"], params["bq"]))
    k_h = chunks(lin(key, params["wk"], params["bk"]))
    v_h = chunks(lin(key, params["wv"], params["bv"]))

    scores = jnp.einsum("bhqd,bhkd->bhqk", q_h, k_h) / jnp.sqrt(jnp.float32(d_k))
    alphas = jax.nn.softmax(scores, axis=-1)
    ctx = jnp.einsum("bhqk,bhkd->bhqd", alphas, v_h)
    ctx = jnp.transpose(ctx, (0, 2, 1, 3)).reshape(B, Lq, d_model)
    return lin(ctx, params["wo"], params["bo"])


# ----------------------------------------------------------------------------
if __name__ == "__main__":
    B, Lq, d_model, n_heads = 2, 8, 32, 4     # d_k = 8

    root = jax.random.PRNGKey(0)
    keys = jax.random.split(root, 12)
    bound = 1.0 / math.sqrt(d_model)          # PyTorch nn.Linear default init range

    def init_w(k):
        return jax.random.uniform(k, (d_model, d_model), jnp.float32, -bound, bound)

    def init_b(k):
        return jax.random.uniform(k, (d_model,), jnp.float32, -bound, bound)

    params = {
        "wq": init_w(keys[0]), "bq": init_b(keys[1]),
        "wk": init_w(keys[2]), "bk": init_b(keys[3]),
        "wv": init_w(keys[4]), "bv": init_b(keys[5]),
        "wo": init_w(keys[6]), "bo": init_b(keys[7]),
    }
    prep = prepare_params(params, n_heads)                       # f32 path

    query = jax.random.normal(keys[8], (B, Lq, d_model), jnp.float32)

    # 1) self-attention (Lk == Lq)
    out = multi_headed_attention_forward(prep, query, query, n_heads)
    out = jax.block_until_ready(out)
    ref = reference_forward(params, query, query, n_heads)
    assert out.shape == (B, Lq, d_model)
    assert jnp.allclose(out, ref, atol=1e-3, rtol=1e-3), "self-attn mismatch"

    # 2) cross-attention (Lk != Lq)
    Lk = 16
    key_cross = jax.random.normal(keys[9], (B, Lk, d_model), jnp.float32)
    out2 = multi_headed_attention_forward(prep, query, key_cross, n_heads)
    out2 = jax.block_until_ready(out2)
    ref2 = reference_forward(params, query, key_cross, n_heads)
    assert jnp.allclose(out2, ref2, atol=1e-3, rtol=1e-3), "cross-attn mismatch"

    # 3) awkward lengths -> exercises zero-padding + in-kernel KV column masking
    Lq3, Lk3 = 24, 200
    q3 = jax.random.normal(keys[10], (B, Lq3, d_model), jnp.float32)
    k3 = jax.random.normal(keys[11], (B, Lk3, d_model), jnp.float32)
    out3 = multi_headed_attention_forward(prep, q3, k3, n_heads)
    out3 = jax.block_until_ready(out3)
    ref3 = reference_forward(params, q3, k3, n_heads)
    assert out3.shape == (B, Lq3, d_model)
    assert jnp.allclose(out3, ref3, atol=1e-3, rtol=1e-3), "ragged-attn mismatch"

    # 4) bf16 intermediates (the MXU/HBM perf path on v6e/v7x); structural check
    prep_bf16 = prepare_params(params, n_heads, dtype=jnp.bfloat16)
    out_bf = multi_headed_attention_forward(prep_bf16, query, query, n_heads)
    out_bf = jax.block_until_ready(out_bf)
    assert jnp.allclose(out_bf.astype(jnp.float32), ref,
                        atol=1e-1, rtol=1e-1), "bf16 path mismatch"

    print("KERNEL_OK")
</pallas_src>

<mosaic_0001>
module attributes {stable_mosaic.version = 11 : i64} {
  func.func @linear_kernel(%arg0: i32, %arg1: i32, %arg2: i32, %arg3: memref<16x32xf32, #tpu.memory_space<vmem>>, %arg4: memref<32x64xf32, #tpu.memory_space<vmem>>, %arg5: memref<1x64xf32, #tpu.memory_space<vmem>>, %arg6: memref<16x64xf32, #tpu.memory_space<vmem>>, %arg7: memref<16x64xf32, #tpu.memory_space<vmem>>) attributes {dimension_semantics = [#tpu.dimension_semantics<parallel>, #tpu.dimension_semantics<parallel>, #tpu.dimension_semantics<arbitrary>], iteration_bounds = array<i64: 1, 1, 1>, scalar_prefetch = 0 : i64, scratch_operands = 1 : i64, tpu.core_type = #tpu.core_type<tc>, window_params = [{transform_indices = @transform_0, window_bounds = array<i64: 16, 32>}, {transform_indices = @transform_1, window_bounds = array<i64: 32, 64>}, {transform_indices = @transform_2, window_bounds = array<i64: 1, 64>}, {transform_indices = @transform_3, window_bounds = array<i64: 16, 64>}]} {
    %c0_i32 = arith.constant 0 : i32
    %0 = arith.cmpi eq, %arg2, %c0_i32 : i32
    %1 = arith.extui %0 : i1 to i32
    %c0_i32_0 = arith.constant 0 : i32
    %2 = arith.cmpi ne, %1, %c0_i32_0 : i32
    scf.if %2 {
      %cst_10 = arith.constant 0.000000e+00 : f32
      %12 = vector.broadcast %cst_10 : f32 to vector<16x64xf32>
      %c0_11 = arith.constant 0 : index
      %c0_12 = arith.constant 0 : index
      %13 = vector.load %arg7[%c0_11, %c0_12] : memref<16x64xf32, #tpu.memory_space<vmem>>, vector<16x64xf32>
      tpu.vector_store %arg7[%c0_11, %c0_12], %12 {strides = array<i32>} : memref<16x64xf32, #tpu.memory_space<vmem>>, vector<16x64xf32>,
    } else {
    }
    %c0 = arith.constant 0 : index
    %c0_1 = arith.constant 0 : index
    %3 = vector.load %arg7[%c0, %c0_1] : memref<16x64xf32, #tpu.memory_space<vmem>>, vector<16x64xf32>
    %c0_2 = arith.constant 0 : index
    %c0_3 = arith.constant 0 : index
    %4 = vector.load %arg3[%c0_2, %c0_3] : memref<16x32xf32, #tpu.memory_space<vmem>>, vector<16x32xf32>
    %c0_4 = arith.constant 0 : index
    %c0_5 = arith.constant 0 : index
    %5 = vector.load %arg4[%c0_4, %c0_5] : memref<32x64xf32, #tpu.memory_space<vmem>>, vector<32x64xf32>
    %cst = arith.constant dense<0.000000e+00> : vector<16x64xf32>
    %6 = tpu.matmul %4, %5, %cst {dimension_numbers = #tpu.dot_dimension_numbers<[1], [0], [0], [1], [0, 0, 1, 1], [], []>} : vector<16x32xf32>, vector<32x64xf32>, vector<16x64xf32> -> vector<16x64xf32>
    %7 = arith.addf %3, %6 : vector<16x64xf32>
    %c0_6 = arith.constant 0 : index
    %c0_7 = arith.constant 0 : index
    %8 = vector.load %arg7[%c0_6, %c0_7] : memref<16x64xf32, #tpu.memory_space<vmem>>, vector<16x64xf32>
    tpu.vector_store %arg7[%c0_6, %c0_7], %7 {strides = array<i32>} : memref<16x64xf32, #tpu.memory_space<vmem>>, vector<16x64xf32>,
    %c0_i32_8 = arith.constant 0 : i32
    %9 = arith.cmpi eq, %arg2, %c0_i32_8 : i32
    %10 = arith.extui %9 : i1 to i32
    %c0_i32_9 = arith.constant 0 : i32
    %11 = arith.cmpi ne, %10, %c0_i32_9 : i32
    scf.if %11 {
      %c0_10 = arith.constant 0 : index
      %c0_11 = arith.constant 0 : index
      %12 = vector.load %arg7[%c0_10, %c0_11] : memref<16x64xf32, #tpu.memory_space<vmem>>, vector<16x64xf32>
      %c0_12 = arith.constant 0 : index
      %c0_13 = arith.constant 0 : index
      %13 = vector.load %arg5[%c0_12, %c0_13] : memref<1x64xf32, #tpu.memory_space<vmem>>, vector<1x64xf32>
      %14 = vector.broadcast %13 : vector<1x64xf32> to vector<16x64xf32>
      %15 = arith.addf %12, %14 : vector<16x64xf32>
      %c0_14 = arith.constant 0 : index
      %c0_15 = arith.constant 0 : index
      %16 = vector.load %arg6[%c0_14, %c0_15] : memref<16x64xf32, #tpu.memory_space<vmem>>, vector<16x64xf32>
      tpu.vector_store %arg6[%c0_14, %c0_15], %15 {strides = array<i32>} : memref<16x64xf32, #tpu.memory_space<vmem>>, vector<16x64xf32>,
    } else {
    }
    return
  }
  func.func @transform_0(%arg0: i32, %arg1: i32, %arg2: i32) -> (i32, i32) {
    %c0_i32 = arith.constant 0 : i32
    return %arg0, %arg2 : i32, i32
  }
  func.func @transform_1(%arg0: i32, %arg1: i32, %arg2: i32) -> (i32, i32) {
    %c0_i32 = arith.constant 0 : i32
    return %arg2, %arg1 : i32, i32
  }
  func.func @transform_2(%arg0: i32, %arg1: i32, %arg2: i32) -> (i32, i32) {
    %c0_i32 = arith.constant 0 : i32
    %c0_i32_0 = arith.constant 0 : i32
    return %c0_i32, %arg1 : i32, i32
  }
  func.func @transform_3(%arg0: i32, %arg1: i32, %arg2: i32) -> (i32, i32) {
    %c0_i32 = arith.constant 0 : i32
    return %arg0, %arg1 : i32, i32
  }
}

</mosaic_0001>

<bundles_post_ra>
// kernel: tpu_custom_call.1
= control target key start
LH: loop header
LB: loop body
LE: loop exit
PB: predicated region body
PF: predicated region fallthrough
CT: control target
= control target key end

     0   :  { %8 = vsyncpa [#allocation4], 0  ;;  %s326_s0 = inlined_call_operand.hbm [shape: f32[16,32], index: 0, kind: input, shape index: {}]   ;;  %s327_s1 = inlined_call_operand.hbm [shape: f32[32,64], index: 1, kind: input, shape index: {}]   ;;  %s328_s2 = inlined_call_operand.vmem [shape: f32[1,64], index: 2, kind: input, shape index: {}]   ;;  %s329_s3 = inlined_call_operand.hbm [shape: f32[16,64], index: 3, kind: output, shape index: {}]  }
   0x1   :  { %9 = vsyncpa [#allocation7], 0 }
   0x2   :  { %10 = vsyncpa [#allocation5], 0  ;;  %s271_s12 = smov [#allocation3]  }
   0x3   :  { %s16_s13 = sshll.u32 %s271_s12, 4  ;;  %s17_s13 = int_to_ptr.vmem [resolvable:$true] %s16_s13 }
   0x4   :  { %s213_s14 = scalar_lea.vmem %s17_s13, 256  ;;  %p218_p1 = scmp.lt.s32.totalorder %s17_s13, %s17_s13 }
   0x5   :  { %p214_p0 = scmp.ne.s32.totalorder %s17_s13, %s213_s14  ;;  %p219_p2 = scmp.lt.s32.totalorder %s213_s14, %s213_s14 }
   0x7   :  { %p220_p3 = por %p219_p2, %p218_p1 }
   0x9   :  { %p221_p4 = pnand %p220_p3, %p214_p0 }
   0xb   :  { %224 = shalt.err (!%p221_p4)
}
   0xc   :  { %s272_s15 = smov 128   ;;  %s273_s16 = smov 8  }
   0xd   :  { %22 = dma.hbm_to_vmem [thread:$0]  %s326_s0, 256, %s17_s13, [#allocation4], %s272_s15, %s272_s15, %s273_s16  }
   0xe   :  { %s274_s19 = smov [#allocation6]  }
   0xf   :  { %s28_s20 = sshll.u32 %s274_s19, 4  ;;  %s29_s20 = int_to_ptr.vmem [resolvable:$true] %s28_s20 }
  0x10   :  { %s233_s21 = scalar_lea.vmem %s29_s20, 512  ;;  %p238_p6 = scmp.lt.s32.totalorder %s29_s20, %s29_s20 }
  0x11   :  { %p234_p5 = scmp.ne.s32.totalorder %s29_s20, %s233_s21  ;;  %p239_p7 = scmp.lt.s32.totalorder %s233_s21, %s233_s21 }
  0x13   :  { %p240_p8 = por %p239_p7, %p238_p6 }
  0x15   :  { %p241_p9 = pnand %p240_p8, %p234_p5 }
  0x17   :  { %244 = shalt.err (!%p241_p9)
}
  0x18   :  { %34 = dma.hbm_to_vmem [thread:$0]  %s327_s1, 512, %s29_s20, [#allocation7], %s272_s15, %s272_s15, %s273_s16  }
  0x19   :  { %265 = dma.done.wait [#allocation4], 256  }
  0x1a   :  { %266 = vsyncadd [#allocation4], 4294967040 }
  0x1b   :  { %267 = dma.done.wait [#allocation7], 512  }
  0x1c   :  { %268 = vsyncadd [#allocation7], 4294966784  ;;  %vm47_vm0 = vcmask 523264   ;;  %v275_v0 = vmov 0.0   ;;  %vm58_vm1 = vcmask 261120   ;;  %v57_v1 = vld [vmem:[#allocation6 + $0x18] sm:$0xff] }
  0x1d   :  { %49 = vst.msk [vmem:[#allocation2 + $0x8] sm:$0xff] %vm47_vm0, %v275_v0  ;;  %48 = vst.msk [vmem:[#allocation2] sm:$0xff] %vm47_vm0, %v275_v0  ;;  %v56_v2 = vld [vmem:[#allocation6 + $0x10] sm:$0xff]  ;;  %188 = vmatprep.subr.mxu0 %v57_v1  ;;  %v55_v4 = vld [vmem:[#allocation6 + $0x8] sm:$0xff]  ;;  %s276_s24 = smov [#allocation8]  }
  0x1e   :  { %v52_v3 = vld [vmem:[#allocation3] sm:$0xff]  ;;  %189 = vmatpush3.msra.mxu0 %v57_v1  ;;  %v54_v5 = vld [vmem:[#allocation6] sm:$0xff]  ;;  %v53_v6 = vld [vmem:[#allocation3 + $0x8] sm:$0xff]  ;;  %s166_s25 = sshll.u32 %s276_s24, 4  ;;  %s167_s25 = int_to_ptr.vmem [resolvable:$true] %s166_s25 }
  0x1f   :  { %196 = vmatprep.mubr.msk.f32.mxu0 %vm58_vm1, %v52_v3  ;;  %190 = vmatprep.subr.mxu0 %v56_v2  ;;  %v181_v13 = vld [vmem:[%s328_s2] ss:$0 sm:$0xff]  ;;  %s245_s26 = scalar_lea.vmem %s167_s25, 256  ;;  %p250_p11 = scmp.lt.s32.totalorder %s167_s25, %s167_s25 }
  0x20   :  { %191 = vmatpush3.msra.mxu0 %v56_v2  ;;  %p246_p10 = scmp.ne.s32.totalorder %s167_s25, %s245_s26  ;;  %p251_p12 = scmp.lt.s32.totalorder %s245_s26, %s245_s26 }
  0x21   :  { %192 = vmatprep.subr.mxu0 %v55_v4 }
  0x22   :  { %193 = vmatpush3.msra.mxu0 %v55_v4  ;;  %p252_p13 = por %p251_p12, %p250_p11 }
  0x23   :  { %194 = vmatprep.subr.mxu0 %v54_v5 }
  0x24   :  { %195 = vmatpush3.msra.mxu0 %v54_v5  ;;  %v51_v7 = vld [vmem:[#allocation2 + $0x8] sm:$0xff]  ;;  %v50_v9 = vld [vmem:[#allocation2] sm:$0xff]  ;;  %p253_p0 = pnand %p252_p13, %p246_p10 }
  0x25   :  { %197 = vmatmul.mubr.msk.f32.vlgmr.msra.gmra.mxu0 %vm58_vm1, %v53_v6 }
  0xe5   :  { %v198_v8 = vpop.f32.mrf.mxu0 }
  0xe6   :  { %v141_v10 = vadd.f32 %v198_v8, %v51_v7 }
  0xe7   :  { %v131_v11 = vpop.f32.mrf.mxu0 }
  0xe8   :  { %144 = vst.msk [vmem:[#allocation2 + $0x8] sm:$0xff] %vm47_vm0, %v141_v10  ;;  %v140_v12 = vadd.f32 %v131_v11, %v50_v9 }
  0xea   :  { %143 = vst.msk [vmem:[#allocation2] sm:$0xff] %vm47_vm0, %v140_v12 }
  0xef   :  { %v149_v14 = vld [vmem:[#allocation2 + $0x8] sm:$0xff] }
  0xf0   :  { %v158_v15 = vadd.f32 %v181_v13, %v149_v14 }
  0xf1   :  { %v148_v16 = vld [vmem:[#allocation2] sm:$0xff] }
  0xf2   :  { %v157_v17 = vadd.f32 %v181_v13, %v148_v16  ;;  %160 = vst.msk [vmem:[#allocation8 + $0x8] sm:$0xff] %vm47_vm0, %v158_v15 }
  0xf4   :  { %159 = vst.msk [vmem:[#allocation8] sm:$0xff] %vm47_vm0, %v157_v17 }
  0xf5   :  { %256 = shalt.err (!%p253_p0)
}
  0xf6   :  { %172 = dma.vmem_to_hbm [thread:$0]  %s167_s25, 256, %s329_s3, [#allocation5], %s272_s15, %s272_s15, %s273_s16  }
  0xf7   :  { %269 = dma.done.wait [#allocation5], 256  }
  0xf8   :  { %270 = vsyncadd [#allocation5], 4294967040 }
  0xf9   :  { %176 = vsyncpa [#allocation4], 1 }
  0xfa   :  { %177 = vsyncpa [#allocation7], 1 }
  0xfb   :  { %178 = vsyncpa [#allocation5], 1 }

</bundles_post_ra>
